<compile_context>
chip_gen: v5e
topology: v5e:2x2
jax: 0.10.0
libtpu: 0.0.40
codegen_flags: <defaults>
</compile_context>

<pallas_src>
import math

import jax
import jax.numpy as jnp
from jax import lax
from jax.experimental import pallas as pl
from jax.experimental.pallas import tpu as pltpu


# ---------------------------------------------------------------------------
# Small helpers
# ---------------------------------------------------------------------------
def _round_up(x, m):
    return ((x + m - 1) // m) * m


def _pick_tile(dim, pref, align):
    """Use the preferred tile if the (padded) dim is big enough, otherwise the
    whole dim rounded up to the hardware alignment (8 sublanes / 128 lanes)."""
    if dim >= pref:
        return pref
    return _round_up(dim, align)


def _pad2(a, rows, cols):
    pr, pc = rows - a.shape[0], cols - a.shape[1]
    if pr == 0 and pc == 0:
        return a
    return jnp.pad(a, ((0, pr), (0, pc)))


# ---------------------------------------------------------------------------
# Kernels
# ---------------------------------------------------------------------------
_CONTRACT_T = (((1,), (1,)), ((), ()))  # x[m,k] . w[n,k]^T -> [m,n], no HBM transpose


def _exp_clip_kernel(l_ref, o_ref):
    # s2_w = exp(clamp(logsig2_w, -11, 11)), element-wise, always in f32.
    o_ref[...] = jnp.exp(jnp.clip(l_ref[...].astype(jnp.float32), -11.0, 11.0))


def _vblinear_map_kernel(x_ref, wmu_ref, b_ref, o_ref, acc_ref):
    k = pl.program_id(2)

    @pl.when(k == 0)
    def _():
        acc_ref[...] = jnp.zeros_like(acc_ref)

    acc_ref[...] += lax.dot_general(
        x_ref[...], wmu_ref[...], _CONTRACT_T,
        preferred_element_type=jnp.float32)

    @pl.when(k == pl.num_programs(2) - 1)
    def _():
        o_ref[...] = (acc_ref[...] + b_ref[...]).astype(o_ref.dtype)


def _vblinear_sample_kernel(x_ref, wmu_ref, s2w_ref, b_ref, eps_ref, o_ref,
                            mu_acc, var_acc):
    k = pl.program_id(2)

    @pl.when(k == 0)
    def _():
        mu_acc[...] = jnp.zeros_like(mu_acc)
        var_acc[...] = jnp.zeros_like(var_acc)

    x = x_ref[...]
    mu_acc[...] += lax.dot_general(
        x, wmu_ref[...], _CONTRACT_T, preferred_element_type=jnp.float32)
    var_acc[...] += lax.dot_general(
        x * x, s2w_ref[...], _CONTRACT_T, preferred_element_type=jnp.float32)

    @pl.when(k == pl.num_programs(2) - 1)
    def _():
        mu = mu_acc[...] + b_ref[...]
        var = var_acc[...] + 1e-8
        o_ref[...] = (mu + jnp.sqrt(var) * eps_ref[...]).astype(o_ref.dtype)


# ---------------------------------------------------------------------------
# Wrappers
# ---------------------------------------------------------------------------
def _exp_clip_s2w(logsig2_p, bm, bn):
    """Tiled element-wise exp(clip(.)) so the EUP work runs once per weight
    element instead of once per batch tile."""
    R, C = logsig2_p.shape
    return pl.pallas_call(
        _exp_clip_kernel,
        out_shape=jax.ShapeDtypeStruct((R, C), jnp.float32),
        grid_spec=pltpu.PrefetchScalarGridSpec(
            num_scalar_prefetch=0,
            grid=(R // bm, C // bn),
            in_specs=[pl.BlockSpec((bm, bn), lambda i, j: (i, j))],
            out_specs=pl.BlockSpec((bm, bn), lambda i, j: (i, j)),
        ),
        compiler_params=pltpu.CompilerParams(
            dimension_semantics=("parallel", "parallel")),
        cost_estimate=pl.CostEstimate(
            flops=R * C, transcendentals=R * C, bytes_accessed=8 * R * C),
    )(logsig2_p)


def vblinear_forward_map(x, mu_w, bias, *, tm=256, tn=512, tk=512):
    """MAP / eval-mode forward:  F.linear(x, mu_w, bias)."""
    B, n_in = x.shape
    n_out = mu_w.shape[0]
    dtype = x.dtype

    tm = _pick_tile(B, tm, 8)
    tn = _pick_tile(n_out, tn, 128)   # lane-dense output stores
    tk = _pick_tile(n_in, tk, 128)
    Bp, n_out_p, n_in_p = _round_up(B, tm), _round_up(n_out, tn), _round_up(n_in, tk)

    x_p = _pad2(x, Bp, n_in_p)
    w_p = _pad2(mu_w, n_out_p, n_in_p)                # stays [n_out, n_in]: no .T
    b_p = _pad2(bias.reshape(1, n_out), 1, n_out_p)

    grid = (Bp // tm, n_out_p // tn, n_in_p // tk)

    # VMEM budget: double-buffered x/w/b/out tiles + f32 accumulator.
    vmem_est = 4 * (2 * (tm * tk + tn * tk + tn + tm * tn) + tm * tn)
    vmem_limit = int(min(max(vmem_est + (2 << 20), 16 << 20), 64 << 20))

    out_p = pl.pallas_call(
        _vblinear_map_kernel,
        out_shape=jax.ShapeDtypeStruct((Bp, n_out_p), dtype),
        grid_spec=pltpu.PrefetchScalarGridSpec(
            num_scalar_prefetch=0,
            grid=grid,
            in_specs=[
                pl.BlockSpec((tm, tk), lambda i, j, k: (i, k)),   # x
                pl.BlockSpec((tn, tk), lambda i, j, k: (j, k)),   # mu_w
                pl.BlockSpec((1, tn), lambda i, j, k: (0, j)),    # bias
            ],
            out_specs=pl.BlockSpec((tm, tn), lambda i, j, k: (i, j)),
            scratch_shapes=[pltpu.VMEM((tm, tn), jnp.float32)],
        ),
        compiler_params=pltpu.CompilerParams(
            dimension_semantics=("parallel", "parallel", "arbitrary"),
            vmem_limit_bytes=vmem_limit),
        cost_estimate=pl.CostEstimate(
            flops=2 * Bp * n_in_p * n_out_p,
            transcendentals=0,
            bytes_accessed=4 * (Bp * n_in_p + n_out_p * n_in_p
                                + n_out_p + Bp * n_out_p)),
    )(x_p, w_p, b_p)

    return out_p[:B, :n_out]


def vblinear_forward_sample(x, mu_w, logsig2_w, bias, key, *, tm=256, tn=512, tk=512):
    """Training-mode forward: local-reparameterization sample."""
    B, n_in = x.shape
    n_out = mu_w.shape[0]
    dtype = x.dtype

    tm = _pick_tile(B, tm, 8)
    tn = _pick_tile(n_out, tn, 128)
    tk = _pick_tile(n_in, tk, 128)
    Bp, n_out_p, n_in_p = _round_up(B, tm), _round_up(n_out, tn), _round_up(n_in, tk)

    x_p = _pad2(x, Bp, n_in_p)
    wmu_p = _pad2(mu_w, n_out_p, n_in_p)
    wls_p = _pad2(logsig2_w, n_out_p, n_in_p)
    b_p = _pad2(bias.reshape(1, n_out), 1, n_out_p)

    # eps matches th.randn_like(mu_out) semantics; drawn once outside, padded.
    eps = jax.random.normal(key, (B, n_out), dtype=dtype)
    eps_p = _pad2(eps, Bp, n_out_p)

    # Hoisted exp(clip(logsig2_w)) -> computed once per weight element (EUP),
    # not once per batch tile inside the matmul kernel.
    s2w_p = _exp_clip_s2w(wls_p, tn, tk)

    grid = (Bp // tm, n_out_p // tn, n_in_p // tk)

    # VMEM budget: 2 weight streams + x + eps + bias + out (double-buffered) + 2 accs.
    vmem_est = 4 * (2 * (tm * tk + 2 * tn * tk + tn + 2 * tm * tn) + 2 * tm * tn)
    vmem_limit = int(min(max(vmem_est + (2 << 20), 16 << 20), 64 << 20))

    out_p = pl.pallas_call(
        _vblinear_sample_kernel,
        out_shape=jax.ShapeDtypeStruct((Bp, n_out_p), dtype),
        grid_spec=pltpu.PrefetchScalarGridSpec(
            num_scalar_prefetch=0,
            grid=grid,
            in_specs=[
                pl.BlockSpec((tm, tk), lambda i, j, k: (i, k)),   # x
                pl.BlockSpec((tn, tk), lambda i, j, k: (j, k)),   # mu_w
                pl.BlockSpec((tn, tk), lambda i, j, k: (j, k)),   # s2_w (precomputed)
                pl.BlockSpec((1, tn), lambda i, j, k: (0, j)),    # bias
                pl.BlockSpec((tm, tn), lambda i, j, k: (i, j)),   # eps
            ],
            out_specs=pl.BlockSpec((tm, tn), lambda i, j, k: (i, j)),
            scratch_shapes=[pltpu.VMEM((tm, tn), jnp.float32),
                            pltpu.VMEM((tm, tn), jnp.float32)],
        ),
        compiler_params=pltpu.CompilerParams(
            dimension_semantics=("parallel", "parallel", "arbitrary"),
            vmem_limit_bytes=vmem_limit),
        cost_estimate=pl.CostEstimate(
            flops=4 * Bp * n_in_p * n_out_p,
            transcendentals=0,
            bytes_accessed=4 * (Bp * n_in_p + 2 * n_out_p * n_in_p
                                + n_out_p + 2 * Bp * n_out_p)),
    )(x_p, wmu_p, s2w_p, b_p, eps_p)

    return out_p[:B, :n_out]


# ---------------------------------------------------------------------------
# Parameter init (mirrors VBLinear.reset_parameters, deterministic)
# ---------------------------------------------------------------------------
def init_vblinear_params(key, n_in, n_out, dtype=jnp.float32):
    k_mu, k_sig = jax.random.split(key)
    stdv = 1.0 / math.sqrt(n_in)
    mu_w = stdv * jax.random.normal(k_mu, (n_out, n_in), dtype=dtype)
    logsig2_w = -9.0 + 0.001 * jax.random.normal(k_sig, (n_out, n_in), dtype=dtype)
    bias = jnp.zeros((n_out,), dtype=dtype)
    return mu_w, logsig2_w, bias


# ---------------------------------------------------------------------------
# Main
# ---------------------------------------------------------------------------
if __name__ == "__main__":
    # Deliberately non-128-aligned shapes (exercise padding) plus small tiles so
    # the demo runs a real multi-step grid (i=2, j=1, k=2) and hits the
    # pl.when init / epilogue paths.  Production calls use the default tiles.
    B, N_IN, N_OUT = 12, 200, 72
    TM, TN, TK = 8, 128, 128

    root = jax.random.PRNGKey(0)
    k_param, k_x, k_eps = jax.random.split(root, 3)

    mu_w, logsig2_w, bias = init_vblinear_params(k_param, N_IN, N_OUT)
    x = jax.random.normal(k_x, (B, N_IN), dtype=jnp.float32)

    # --- MAP / eval mode ---
    out_map = vblinear_forward_map(x, mu_w, bias, tm=TM, tn=TN, tk=TK)
    out_map = jax.block_until_ready(out_map)

    ref_map = x @ mu_w.T + bias
    assert jnp.allclose(out_map, ref_map, atol=1e-4, rtol=1e-4), "MAP mode mismatch"

    # --- training / sampling mode ---
    out_sample = vblinear_forward_sample(x, mu_w, logsig2_w, bias, k_eps,
                                         tm=TM, tn=TN, tk=TK)
    out_sample = jax.block_until_ready(out_sample)

    eps = jax.random.normal(k_eps, (B, N_OUT), dtype=jnp.float32)
    s2_w = jnp.exp(jnp.clip(logsig2_w, -11.0, 11.0))
    var_ref = (x * x) @ s2_w.T + 1e-8
    ref_sample = ref_map + jnp.sqrt(var_ref) * eps
    assert jnp.allclose(out_sample, ref_sample, atol=1e-4, rtol=1e-4), \
        "sample mode mismatch"

    print("KERNEL_OK")
</pallas_src>

<mosaic_0001>
module attributes {stable_mosaic.version = 11 : i64} {
  func.func @_vblinear_map_kernel(%arg0: i32, %arg1: i32, %arg2: i32, %arg3: memref<8x128xf32, #tpu.memory_space<vmem>>, %arg4: memref<128x128xf32, #tpu.memory_space<vmem>>, %arg5: memref<1x128xf32, #tpu.memory_space<vmem>>, %arg6: memref<8x128xf32, #tpu.memory_space<vmem>>, %arg7: memref<8x128xf32, #tpu.memory_space<vmem>>) attributes {dimension_semantics = [#tpu.dimension_semantics<parallel>, #tpu.dimension_semantics<parallel>, #tpu.dimension_semantics<arbitrary>], iteration_bounds = array<i64: 2, 1, 2>, scalar_prefetch = 0 : i64, scratch_operands = 1 : i64, tpu.core_type = #tpu.core_type<tc>, window_params = [{transform_indices = @transform_0, window_bounds = array<i64: 8, 128>}, {transform_indices = @transform_1, window_bounds = array<i64: 128, 128>}, {transform_indices = @transform_2, window_bounds = array<i64: 1, 128>}, {transform_indices = @transform_3, window_bounds = array<i64: 8, 128>}]} {
    %c0_i32 = arith.constant 0 : i32
    %0 = arith.cmpi eq, %arg2, %c0_i32 : i32
    %1 = arith.extui %0 : i1 to i32
    %c0_i32_0 = arith.constant 0 : i32
    %2 = arith.cmpi ne, %1, %c0_i32_0 : i32
    scf.if %2 {
      %cst_9 = arith.constant 0.000000e+00 : f32
      %12 = vector.broadcast %cst_9 : f32 to vector<8x128xf32>
      %c0_10 = arith.constant 0 : index
      %c0_11 = arith.constant 0 : index
      %13 = vector.load %arg7[%c0_10, %c0_11] : memref<8x128xf32, #tpu.memory_space<vmem>>, vector<8x128xf32>
      tpu.vector_store %arg7[%c0_10, %c0_11], %12 {strides = array<i32>} : memref<8x128xf32, #tpu.memory_space<vmem>>, vector<8x128xf32>,
    } else {
    }
    %c0 = arith.constant 0 : index
    %c0_1 = arith.constant 0 : index
    %3 = vector.load %arg7[%c0, %c0_1] : memref<8x128xf32, #tpu.memory_space<vmem>>, vector<8x128xf32>
    %c0_2 = arith.constant 0 : index
    %c0_3 = arith.constant 0 : index
    %4 = vector.load %arg3[%c0_2, %c0_3] : memref<8x128xf32, #tpu.memory_space<vmem>>, vector<8x128xf32>
    %c0_4 = arith.constant 0 : index
    %c0_5 = arith.constant 0 : index
    %5 = vector.load %arg4[%c0_4, %c0_5] : memref<128x128xf32, #tpu.memory_space<vmem>>, vector<128x128xf32>
    %cst = arith.constant dense<0.000000e+00> : vector<8x128xf32>
    %6 = tpu.matmul %4, %5, %cst {dimension_numbers = #tpu.dot_dimension_numbers<[1], [1], [0], [0], [0, 0, 1, 0], [], []>} : vector<8x128xf32>, vector<128x128xf32>, vector<8x128xf32> -> vector<8x128xf32>
    %7 = arith.addf %3, %6 : vector<8x128xf32>
    %c0_6 = arith.constant 0 : index
    %c0_7 = arith.constant 0 : index
    %8 = vector.load %arg7[%c0_6, %c0_7] : memref<8x128xf32, #tpu.memory_space<vmem>>, vector<8x128xf32>
    tpu.vector_store %arg7[%c0_6, %c0_7], %7 {strides = array<i32>} : memref<8x128xf32, #tpu.memory_space<vmem>>, vector<8x128xf32>,
    %c1_i32 = arith.constant 1 : i32
    %9 = arith.cmpi eq, %arg2, %c1_i32 : i32
    %10 = arith.extui %9 : i1 to i32
    %c0_i32_8 = arith.constant 0 : i32
    %11 = arith.cmpi ne, %10, %c0_i32_8 : i32
    scf.if %11 {
      %c0_9 = arith.constant 0 : index
      %c0_10 = arith.constant 0 : index
      %12 = vector.load %arg7[%c0_9, %c0_10] : memref<8x128xf32, #tpu.memory_space<vmem>>, vector<8x128xf32>
      %c0_11 = arith.constant 0 : index
      %c0_12 = arith.constant 0 : index
      %13 = vector.load %arg5[%c0_11, %c0_12] : memref<1x128xf32, #tpu.memory_space<vmem>>, vector<1x128xf32>
      %14 = vector.broadcast %13 : vector<1x128xf32> to vector<8x128xf32>
      %15 = arith.addf %12, %14 : vector<8x128xf32>
      %c0_13 = arith.constant 0 : index
      %c0_14 = arith.constant 0 : index
      %16 = vector.load %arg6[%c0_13, %c0_14] : memref<8x128xf32, #tpu.memory_space<vmem>>, vector<8x128xf32>
      tpu.vector_store %arg6[%c0_13, %c0_14], %15 {strides = array<i32>} : memref<8x128xf32, #tpu.memory_space<vmem>>, vector<8x128xf32>,
    } else {
    }
    return
  }
  func.func @transform_0(%arg0: i32, %arg1: i32, %arg2: i32) -> (i32, i32) {
    %c0_i32 = arith.constant 0 : i32
    return %arg0, %arg2 : i32, i32
  }
  func.func @transform_1(%arg0: i32, %arg1: i32, %arg2: i32) -> (i32, i32) {
    %c0_i32 = arith.constant 0 : i32
    return %arg1, %arg2 : i32, i32
  }
  func.func @transform_2(%arg0: i32, %arg1: i32, %arg2: i32) -> (i32, i32) {
    %c0_i32 = arith.constant 0 : i32
    %c0_i32_0 = arith.constant 0 : i32
    return %c0_i32, %arg1 : i32, i32
  }
  func.func @transform_3(%arg0: i32, %arg1: i32, %arg2: i32) -> (i32, i32) {
    %c0_i32 = arith.constant 0 : i32
    return %arg0, %arg1 : i32, i32
  }
}

</mosaic_0001>

<bundles_post_ra>
// kernel: tpu_custom_call.1
= control target key start
LH: loop header
LB: loop body
LE: loop exit
PB: predicated region body
PF: predicated region fallthrough
CT: control target
= control target key end

     0   :  { %s1154_s0 = inlined_call_operand.hbm [shape: f32[16,256], index: 0, kind: input, shape index: {}]   ;;  %s1155_s1 = inlined_call_operand.hbm [shape: f32[128,256], index: 1, kind: input, shape index: {}]   ;;  %s1156_s2 = inlined_call_operand.vmem [shape: f32[1,128], index: 2, kind: input, shape index: {}]   ;;  %s1157_s3 = inlined_call_operand.hbm [shape: f32[16,128], index: 3, kind: output, shape index: {}]  }
   0x1   :  { %1165 = sst [smem:[#allocation21_spill]] %s1154_s0 }
   0x2   :  { %8 = vsyncpa [#allocation4], 0 }
   0x3   :  { %10 = vsyncpa [#allocation4 + $0x1], 0 }
   0x4   :  { %11 = vsyncpa [#allocation7], 0 }
   0x5   :  { %13 = vsyncpa [#allocation7 + $0x1], 0 }
   0x6   :  { %14 = vsyncpa [#allocation5], 0 }
   0x7   :  { %16 = vsyncpa [#allocation5 + $0x1], 0  ;;  %s863_s12 = smov 0   ;;  %s865_s13 = smov 0  }
   0x8   :  { %s867_s14 = smov 0   ;;  %s869_s15 = smov 0  }
   0x9   :  { %s871_s16 = smov 0   ;;  %s873_s17 = smov 0  }
   0xa   :  { %s875_s18 = smov 0   ;;  %s877_s19 = smov 0  }
   0xb   :  { %s879_s20 = smov 0   ;;  %s881_s21 = smov 0  }
   0xc   :  { %s883_s22 = smov 0   ;;  %s885_s23 = smov 0  }
   0xd   :  { %s887_s24 = smov 0   ;;  %s889_s25 = smov 0  }
   0xe LB: > { %1166 = sst [smem:[#allocation12_spill]] %s793_s14  ;;  %s1158_s26 = sadd.s32 4294967295, %s837_s25   ;;  %s837_s25 = sphi %s889_s25, %s22_s25   ;;  %s833_s24 = sphi %s887_s24, %s1195_s24   ;;  %s829_s23 = sphi %s885_s23, %s1204_s23   ;;  %s825_s22 = sphi %s883_s22, %s1193_s22   ;;  %s821_s21 = sphi %s881_s21, %s1203_s21   ;;  %s817_s20 = sphi %s879_s20, %s1192_s20   ;;  %s813_s19 = sphi %s877_s19, %s1202_s19   ;;  %s809_s18 = sphi %s875_s18, %s1201_s18   ;;  %s805_s17 = sphi %s873_s17, %s1200_s17   ;;  %s801_s16 = sphi %s871_s16, %s1199_s16   ;;  %s797_s15 = sphi %s869_s15, %s1198_s15   ;;  %s793_s14 = sphi %s867_s14, %s1189_s14   ;;  %s789_s13 = sphi %s865_s13, %s1197_s13   ;;  %s785_s12 = sphi %s863_s12, %s1196_s12  }
   0xf   : > { %1167 = sst [smem:[#allocation13_spill]] %s817_s20  ;;  %s34_s28 = sadd.s32 1, %s829_s23 }
  0x10   : > { %1168 = sst [smem:[#allocation14_spill]] %s833_s24  ;;  %s41_s29 = sadd.s32 1, %s833_s24 }
  0x11   : > { %p35_p0 = scmp.ge.s32.totalorder %s34_s28, 2  ;;  %s50_s30 = sadd.s32 1, %s817_s20 }
  0x12   : > { %p57_p1 = scmp.ne.s32.totalorder %s817_s20, %s813_s19  ;;  %p58_p2 = scmp.eq.s32.totalorder %s837_s25, 0 }
  0x13   : > { %s1206_s28 = smov (%p35_p0, %s34_s28), 0  ;;  %s1208_s29 = smov (!%p35_p0, %s41_s29), %s833_s24 }
  0x14   : > { %1169 = sst [smem:[#allocation15_spill]] %s1206_s28  ;;  %s46_s4 = ssub.s32 %s829_s23, %s1206_s28 }
  0x15   : > { %p946_p3 = por %p58_p2, %p57_p1  ;;  %p43_p4 = scmp.ge.s32.totalorder %s1208_s29, 2 }
  0x16   : > { %p63_p5 = scmp.ne.s32.totalorder %s813_s19, %s809_s18  ;;  %p953_p6 = scmp.eq.s32.totalorder %s1158_s26, 0 }
  0x17   : > { %p76_p7 = scmp.eq.s32.totalorder %s46_s4, 0  ;;  %s1210_s29 = smov (%p43_p4, %s1208_s29), 0 }
  0x18   : > { %1172 = sst [smem:[#allocation16_spill]] %s1210_s29  ;;  %p961_p8 = por %p953_p6, %p63_p5 }
  0x19   : > { %s78_s8 = sadd.s32 1, %s805_s17  ;;  %s45_s9 = ssub.s32 %s833_s24, %s1210_s29 }
  0x1a   : > { %p85_p9 = scmp.ne.s32.totalorder %s805_s17, %s801_s16  ;;  %s47_s10 = sor.u32 %s46_s4, %s45_s9 }
  0x1b   : > { %p91_p10 = scmp.ne.s32.totalorder %s801_s16, %s797_s15  ;;  %p48_p11 = scmp.eq.s32.totalorder %s47_s10, 0 }
  0x1c   : > { %p974_p12 = por %p85_p9, %p58_p2  ;;  %p130_p0 = scmp.eq.s32.totalorder %s45_s9, 0 }
  0x1d   : > { %s979_s18 = scalar_select %p76_p7, %s805_s17, %s78_s8  }
  0x1e   : > { %s982_s27 = scalar_select %p48_p11, %s817_s20, %s50_s30  }
  0x1f   : > { %1175 = sst [smem:[#allocation17_spill]] %s979_s18  ;;  %p986_p13 = por %p91_p10, %p953_p6 }
  0x20   : > { %1176 = sst [smem:[#allocation18_spill]] %s982_s27  ;;  %s132_s15 = sadd.s32 1, %s793_s14 }
  0x21   : > { %p142_p1 = scmp.ne.s32.totalorder %s793_s14, %s789_s13  ;;  %s1179_s10 = sadd.s32 4294967295, %s837_s25  }
  0x22   : > { %s994_s4 = scalar_select %p130_p0, %s793_s14, %s132_s15  }
  0x23   : > { %p143_p2 = scmp.eq.s32.totalorder %s1179_s10, 3  ;;  %p148_p4 = scmp.ne.s32.totalorder %s789_s13, %s785_s12 }
  0x24   : > { %1178 = sst [smem:[#allocation19_spill]] %s994_s4  ;;  %s1180_s8 = sadd.s32 4294967294, %s837_s25  }
  0x25   : > { %p149_p5 = scmp.eq.s32.totalorder %s1180_s8, 3  ;;  %p1002_p7 = por %p143_p2, %p142_p1 }
  0x26   : > { %p508_p6 = scmp.lt.s32.totalorder %s837_s25, 4  ;;  %s175_s9 = sand.u32 1, %s817_s20  }
  0x27   : > { %p1007_p9 = por %p149_p5, %p148_p4  ;;  %s476_s15 = sshll.u32 %s175_s9, 3 }
  0x28   : > { %s477_s10 = sshll.u32 %s833_s24, 1  ;;  %s179_s28 = scalar_lea.vmem [#allocation3], %s476_s15 }
  0x29   : > { %s1182_s6 = scalar_select %p1007_p9, 1, 0 }
  0x2a   : > { %s183_s29 = sadd.s32 %s829_s23, %s477_s10  ;;  %s189_s27 = sshll.u32 %s179_s28, 4  ;;  %s190_s27 = int_to_ptr.vmem [resolvable:$true] %s189_s27 }
  0x2b   : > { %1183 = sst [smem:[#allocation20_spill]] %s1182_s6  ;;  %s478_s8 = sshll.u32 %s183_s29, 3 }
  0x2c   : > { %s1184_s0 = sld [smem:[#allocation21_spill]]  ;;  %p498_p10 = pnand %p508_p6, %p946_p3 }
  0x2d   : > { %p1025_p11 = pnand %p508_p6, %p974_p12  ;;  %s176_s15 = scalar_lea.sflag [#allocation4], %s175_s9 }
  0x2e   : > { %p481_p0 = scmp.ge.s32.totalorder %s837_s25, 1  ;;  %p218_p1 = scmp.lt.s32.totalorder %s837_s25, 5 }
  0x2f   : > { %s196_s28 = sand.u32 1, %s805_s17   ;;  %s480_s18 = sshll.u32 %s829_s23, 3 }
  0x30   : > { %s479_s29 = sshll.u32 %s196_s28, 7  ;;  %p219_p2 = pnand %p481_p0, %p218_p1 }
  0x31   : > { %s200_s5 = scalar_lea.vmem [#allocation6], %s479_s29  ;;  %s207_s11 = scalar_lea.hbm %s1155_s1, %s480_s18 }
  0x32   : > { %s185_s14 = scalar_lea.hbm %s1184_s0, %s478_s8  ;;  %s210_s4 = sshll.u32 %s200_s5, 4  ;;  %s211_s4 = int_to_ptr.vmem [resolvable:$true] %s210_s4 }
  0x33   : > { %s187_s6 = sshll.u32 %s185_s14, 4  ;;  %s208_s8 = sshll.u32 %s207_s11, 4  ;;  %s188_s6 = int_to_ptr.hbm [resolvable:$true] %s187_s6  ;;  %s209_s8 = int_to_ptr.hbm [resolvable:$true] %s208_s8 }
  0x34   : > { %500 = dma.hbm_to_vmem [thread:$0]  (!%p498_p10), %s188_s6, 128, %s190_s27, %s176_s15  }
  0x35   : > { %s197_s0 = scalar_lea.sflag [#allocation7], %s196_s28  ;;  %s839_s24 = smov 256  }
  0x36   : > { %s840_s9 = smov 128   ;;  %s841_s27 = smov 8  }
  0x37   : > { %503 = dma.hbm_to_vmem [thread:$0]  (!%p1025_p11), %s209_s8, 2048, %s211_s4, %s197_s0, %s839_s24, %s840_s9, %s841_s27  }
  0x38   : > { %222 = sbr.rel (%p219_p2) target bundleno = 293 (0x125), region = 32  ;;  %s224_s6 = sand.u32 (!%p219_p2), 1, %s813_s19  }
  0x39   : > { %s1039_s15 = sshll.u32 (!%p219_p2), %s224_s6, 3  ;;  %s225_s29 = scalar_lea.sflag (!%p219_p2), [#allocation4], %s224_s6 }
  0x3a   : > { %s228_s5 = scalar_lea.vmem (!%p219_p2), [#allocation3], %s1039_s15 }
  0x3d   : > { %772 = dma.done.wait (%p961_p8), %s225_s29, 128  }
  0x3e   : > { %774 = vsyncadd (%p961_p8), %s225_s29, 4294967168  ;;  %s234_s28 = sand.u32 1, %s801_s16  }
  0x3f   : > { %s483_s18 = sshll.u32 %s234_s28, 7  ;;  %s235_s20 = scalar_lea.sflag [#allocation7], %s234_s28 }
  0x40   : > { %s1047_s0 = scalar_lea.vmem [#allocation6], %s483_s18 }
  0x41   : > { %776 = dma.done.wait (%p986_p13), %s235_s20, 2048  }
  0x42   : > { %778 = vsyncadd (%p986_p13), %s235_s20, 4294965248  ;;  %s267_s24 = sand.u32 1, %s789_s13   ;;  %p485_p3 = scmp.ne.s32.totalorder %s821_s21, 0 }
  0x43   : > { %s1056_s4 = sshll.u32 %s267_s24, 3 }
  0x44   : > { %s269_s7 = scalar_lea.vmem [#allocation8], %s1056_s4  ;;  %277 = sbr.rel (%p485_p3) target bundleno = 75 (0x4b), region = 44 }
  0x49   : > { %v842_v0 = vmov 0.0  }
  0x4a   : > { %278 = vst [vmem:[#allocation2] sm:$0xff] %v842_v0 }
  0x4b PF: > { %v296_v1 = vld [vmem:[%s1047_s0 + $0x78] sm:$0xff]  ;;  %v295_v2 = vld [vmem:[%s1047_s0 + $0x70] sm:$0xff]  ;;  %v294_v3 = vld [vmem:[%s1047_s0 + $0x68] sm:$0xff]  ;;  %p486_p8 = scmp.ne.s32.totalorder %s821_s21, 1 }
  0x4c   : > { %297 = vmatpush.xpose.msra.mxu0 %v296_v1  ;;  %v293_v4 = vld [vmem:[%s1047_s0 + $0x60] sm:$0xff]  ;;  %v292_v5 = vld [vmem:[%s1047_s0 + $0x58] sm:$0xff]  ;;  %v291_v6 = vld [vmem:[%s1047_s0 + $0x50] sm:$0xff] }
  0x4d   : > { %v290_v7 = vld [vmem:[%s1047_s0 + $0x48] sm:$0xff]  ;;  %v289_v8 = vld [vmem:[%s1047_s0 + $0x40] sm:$0xff]  ;;  %v288_v9 = vld [vmem:[%s1047_s0 + $0x38] sm:$0xff] }
  0x4e   : > { %v287_v10 = vld [vmem:[%s1047_s0 + $0x30] sm:$0xff]  ;;  %v286_v11 = vld [vmem:[%s1047_s0 + $0x28] sm:$0xff]  ;;  %v285_v12 = vld [vmem:[%s1047_s0 + $0x20] sm:$0xff] }
  0x4f   : > { %v284_v13 = vld [vmem:[%s1047_s0 + $0x18] sm:$0xff]  ;;  %v283_v14 = vld [vmem:[%s1047_s0 + $0x10] sm:$0xff]  ;;  %v282_v15 = vld [vmem:[%s1047_s0 + $0x8] sm:$0xff] }
  0x50   : > { %298 = vmatpush.xpose.msra.mxu0 %v295_v2  ;;  %v281_v16 = vld [vmem:[%s1047_s0] sm:$0xff]  ;;  %v280_v17 = vld [vmem:[%s228_s5] sm:$0xff] }
  0x51   : > { %v279_v18 = vld [vmem:[#allocation2] sm:$0xff] }
  0x54   : > { %299 = vmatpush.xpose.msra.mxu0 %v294_v3 }
  0x58   : > { %300 = vmatpush.xpose.msra.mxu0 %v293_v4 }
  0x5c   : > { %301 = vmatpush.xpose.msra.mxu0 %v292_v5 }
  0x60   : > { %302 = vmatpush.xpose.msra.mxu0 %v291_v6 }
  0x64   : > { %303 = vmatpush.xpose.msra.mxu0 %v290_v7 }
  0x68   : > { %304 = vmatpush.xpose.msra.mxu0 %v289_v8 }
  0x6c   : > { %305 = vmatpush.xpose.msra.mxu0 %v288_v9 }
  0x70   : > { %306 = vmatpush.xpose.msra.mxu0 %v287_v10 }
  0x74   : > { %307 = vmatpush.xpose.msra.mxu0 %v286_v11 }
  0x78   : > { %308 = vmatpush.xpose.msra.mxu0 %v285_v12 }
  0x7c   : > { %309 = vmatpush.xpose.msra.mxu0 %v284_v13 }
  0x80   : > { %310 = vmatpush.xpose.msra.mxu0 %v283_v14 }
  0x84   : > { %311 = vmatpush.xpose.msra.mxu0 %v282_v15 }
  0x88   : > { %312 = vmatpush.xpose.msra.mxu0 %v281_v16 }
  0x8b   : > { %313 = vmatmul.f32.vlgmr.msra.gmra.mxu0 %v280_v17 }
 0x107   : > { %322 = sbr.rel (%p486_p8) target bundleno = 278 (0x116), region = 48 }
 0x108   : > { %v314_v19 = vpop.f32.mrf.mxu0 }
 0x109   : > { %v317_v20 = vadd.f32 %v314_v19, %v279_v18 }
 0x10b   : > { %318 = vst [vmem:[#allocation2] sm:$0xff] %v317_v20 }
 0x10c   : > { %v626_v22 = vld [vmem:[%s1156_s2] ss:$0 sm:$0xff] }
 0x112   : > { %v323_v21 = vld [vmem:[#allocation2] sm:$0xff] }
 0x113   : > { %v328_v23 = vadd.f32 %v626_v22, %v323_v21 }
 0x115   : > { %329 = vst [vmem:[%s269_s7] sm:$0xff] %v328_v23 }
 0x116 PF: > { %s488_s14 = sshll.u32 %s825_s22, 3  ;;  %s344_s9 = sshll.u32 %s269_s7, 4  ;;  %s345_s9 = int_to_ptr.vmem [resolvable:$true] %s344_s9 }
 0x117   : > { %s342_s21 = scalar_lea.hbm %s1157_s3, %s488_s14  ;;  %s331_s6 = scalar_lea.sflag [#allocation5], %s267_s24 }
 0x118   : > { %s346_s27 = sshll.u32 %s342_s21, 4  ;;  %s707_s28 = scalar_lea.hbm %s1157_s3, 16  ;;  %s347_s27 = int_to_ptr.hbm [resolvable:$true] %s346_s27 }
 0x119   : > { %s701_s15 = sshra.s32 %s347_s27, 4  ;;  %s702_s15 = int_to_ptr.hbm [resolvable:$true] %s701_s15 }
 0x11a   : > { %s703_s29 = scalar_lea.hbm %s702_s15, 8  ;;  %p708_p5 = scmp.lt.s32.totalorder %s702_s15, %s1157_s3 }
 0x11b   : > { %p704_p12 = scmp.ne.s32.totalorder %s702_s15, %s703_s29  ;;  %p709_p6 = scmp.lt.s32.totalorder %s707_s28, %s703_s29 }
 0x11d   : > { %p705_p13 = pnand %p704_p12, %p1002_p7  ;;  %p710_p10 = por %p709_p6, %p708_p5 }
 0x11f   : > { %p706_p4 = pneg %p705_p13 }
 0x121   : > { %p711_p11 = pnand %p710_p10, %p706_p4 }
 0x123   : > { %714 = shalt.err (!%p711_p11)
}
 0x124   : > { %495 = dma.vmem_to_hbm [thread:$0]  (%p1002_p7), %s345_s9, 128, %s347_s27, %s331_s6  }
 0x125 PF: > { %p509_p0 = scmp.ge.s32.totalorder %s837_s25, 2  ;;  %s358_s24 = sand.u32 1, %s785_s12  }
 0x126   : > { %s359_s4 = scalar_lea.sflag [#allocation5], %s358_s24 }
 0x127   : > { %p505_p1 = pnand %p509_p0, %p1007_p9 }
 0x129   : > { %p506_p2 = pneg %p505_p1 }
 0x12b   : > { %780 = dma.done.wait (%p506_p2), %s359_s4, 128  }
 0x12c   : > { %782 = vsyncadd (%p506_p2), %s359_s4, 4294967168  ;;  %s22_s25 = sadd.s32 1, %s837_s25   ;;  %s1188_s30 = sld [smem:[#allocation12_spill]] }
 0x12d   : > { %p1107_p3 = scmp.ge.s32.totalorder %s22_s25, 6   ;;  %s1189_s14 = sld [smem:[#allocation19_spill]] }
 0x12e   : > { %s1190_s26 = sld [smem:[#allocation17_spill]]  ;;  %s1196_s12 = smov %s789_s13 }
 0x12f   : > { %s1191_s10 = sld [smem:[#allocation13_spill]]  ;;  %s1198_s15 = smov %s801_s16 }
 0x130   : > { %s1192_s20 = sld [smem:[#allocation18_spill]]  ;;  %s1199_s16 = smov %s805_s17 }
 0x131   : > { %s1193_s22 = sld [smem:[#allocation14_spill]]  ;;  %s1201_s18 = smov %s813_s19 }
 0x132   : > { %s1194_s11 = sld [smem:[#allocation15_spill]]  ;;  %s1197_s13 = smov %s1188_s30 }
 0x133   : > { %s1195_s24 = sld [smem:[#allocation16_spill]]  ;;  %s1203_s21 = smov %s829_s23 }
 0x134   : > { %s1200_s17 = smov %s1190_s26  ;;  %21 = sbr.rel (!%p1107_p3) target bundleno = 14 (0xe), region = 101 }
 0x135   : > { %s1202_s19 = smov %s1191_s10 }
 0x138   : > { %s1204_s23 = smov %s1194_s11 }
 0x139   :  { %365 = vsyncpa [#allocation4], 1 }
 0x13a   :  { %367 = vsyncpa [#allocation4 + $0x1], 1 }
 0x13b   :  { %368 = vsyncpa [#allocation7], 1 }
 0x13c   :  { %370 = vsyncpa [#allocation7 + $0x1], 1 }
 0x13d   :  { %371 = vsyncpa [#allocation5], 1 }
 0x13e   :  { %373 = vsyncpa [#allocation5 + $0x1], 1 }

</bundles_post_ra>
